<compile_context>
chip_gen: v7x
topology: tpu7x:2x2x1
jax: 0.10.0
libtpu: 0.0.40
codegen_flags: <defaults>
</compile_context>

<pallas_src>
import functools

import jax
import jax.numpy as jnp
from jax.experimental import pallas as pl
from jax.experimental.pallas import tpu as pltpu


def _mlp_kernel(x_ref, w1_ref, b1_ref, w2_ref, b2_ref, w3_ref, b3_ref, o_ref):
    # Entire 3-layer MLP fused in one kernel invocation per batch tile.
    # Weights arrive as bf16; activations are cast to bf16 only for the MXU,
    # accumulation and elementwise math stay f32.
    x = x_ref[...].astype(jnp.bfloat16)                                # (tb, 9)
    h1 = jnp.dot(x, w1_ref[...], preferred_element_type=jnp.float32)  # (tb, 256)
    h1 = jnp.maximum(h1 + b1_ref[...], 0.0)
    h2 = jnp.dot(h1.astype(jnp.bfloat16), w2_ref[...],
                 preferred_element_type=jnp.float32)                   # (tb, 512)
    h2 = jnp.maximum(h2 + b2_ref[...], 0.0)
    out = jnp.dot(h2.astype(jnp.bfloat16), w3_ref[...],
                  preferred_element_type=jnp.float32)                  # (tb, 9)
    o_ref[...] = (out + b3_ref[...]).astype(o_ref.dtype)


def _round_up(n, m):
    return ((n + m - 1) // m) * m


@functools.partial(jax.jit, static_argnames=("block_b",))
def rotation_translation_net(x, params, block_b=512):
    """x: [B, 9] float32. params: dict of w1,b1,w2,b2,w3,b3. Returns [B, 9]."""
    w1, b1 = params["w1"], params["b1"]   # (9, 256),   (1, 256)
    w2, b2 = params["w2"], params["b2"]   # (256, 512), (1, 512)
    w3, b3 = params["w3"], params["b3"]   # (512, 9),   (1, 9)
    B, F = x.shape
    assert F == 9

    # Batch tile: big (default 512) to fill the MXU M dim, clamped for small
    # batches.  Pad B to a multiple of the tile; slice the pad off at the end.
    tb = min(block_b, _round_up(B, 8))
    assert tb % 8 == 0
    Bp = _round_up(B, tb)
    if Bp != B:
        x = jnp.pad(x, ((0, Bp - B), (0, 0)))

    # Cast weights once to bf16 for the MXU (f32 accumulation in-kernel).
    w1b = w1.astype(jnp.bfloat16)
    w2b = w2.astype(jnp.bfloat16)
    w3b = w3.astype(jnp.bfloat16)

    grid = (Bp // tb,)

    # Weights/biases: full-array blocks with constant index_maps -> the
    # pipeline keeps them resident in VMEM across grid steps (no re-DMA).
    def full(shape):
        return pl.BlockSpec(shape, lambda i, _n=len(shape): (0,) * _n)

    flops = 2 * Bp * (9 * 256 + 256 * 512 + 512 * 9)
    weight_bytes = (9 * 256 + 256 * 512 + 512 * 9) * 2 + (256 + 512 + 9) * 4
    bytes_accessed = Bp * 9 * 4 * 2 + weight_bytes

    out = pl.pallas_call(
        _mlp_kernel,
        out_shape=jax.ShapeDtypeStruct((Bp, 9), jnp.float32),
        grid_spec=pltpu.PrefetchScalarGridSpec(
            num_scalar_prefetch=0,
            grid=grid,
            in_specs=[
                pl.BlockSpec((tb, 9), lambda i: (i, 0)),   # x tile
                full(w1b.shape), full(b1.shape),
                full(w2b.shape), full(b2.shape),
                full(w3b.shape), full(b3.shape),
            ],
            out_specs=pl.BlockSpec((tb, 9), lambda i: (i, 0)),
        ),
        compiler_params=pltpu.CompilerParams(
            dimension_semantics=("parallel",),
        ),
        cost_estimate=pl.CostEstimate(
            flops=flops, transcendentals=0, bytes_accessed=bytes_accessed),
    )(x, w1b, b1, w2b, b2, w3b, b3)

    return out[:B]


def init_params(key):
    """Deterministic init mimicking PyTorch's U(-1/sqrt(fan_in), 1/sqrt(fan_in))."""
    dims = [(9, 256), (256, 512), (512, 9)]
    params = {}
    keys = jax.random.split(key, 2 * len(dims))
    for idx, (fan_in, fan_out) in enumerate(dims):
        bound = 1.0 / jnp.sqrt(float(fan_in))
        w = jax.random.uniform(keys[2 * idx], (fan_in, fan_out),
                               minval=-bound, maxval=bound, dtype=jnp.float32)
        b = jax.random.uniform(keys[2 * idx + 1], (1, fan_out),
                               minval=-bound, maxval=bound, dtype=jnp.float32)
        params[f"w{idx + 1}"] = w
        params[f"b{idx + 1}"] = b
    return params


def _reference_f32(x, p):
    h1 = jnp.maximum(x @ p["w1"] + p["b1"], 0.0)
    h2 = jnp.maximum(h1 @ p["w2"] + p["b2"], 0.0)
    return h2 @ p["w3"] + p["b3"]


def _reference_bf16(x, p):
    # Matched-precision reference: bf16 MXU operands, f32 accumulation.
    bf = jnp.bfloat16
    h1 = jnp.dot(x.astype(bf), p["w1"].astype(bf),
                 preferred_element_type=jnp.float32) + p["b1"]
    h1 = jnp.maximum(h1, 0.0)
    h2 = jnp.dot(h1.astype(bf), p["w2"].astype(bf),
                 preferred_element_type=jnp.float32) + p["b2"]
    h2 = jnp.maximum(h2, 0.0)
    return jnp.dot(h2.astype(bf), p["w3"].astype(bf),
                   preferred_element_type=jnp.float32) + p["b3"]


if __name__ == "__main__":
    key = jax.random.PRNGKey(0)
    k_x, k_p = jax.random.split(key)

    B = 16  # small demo batch; wrapper clamps the 512-row tile down to 16
    x = jax.random.normal(k_x, (B, 9), dtype=jnp.float32)
    params = init_params(k_p)

    out = rotation_translation_net(x, params)
    out = jax.block_until_ready(out)
    assert out.shape == (B, 9)

    # Also exercise the padded / multi-step-grid path once (B not a tile
    # multiple, B > block_b) to make sure padding + slicing are correct.
    B2 = 1034
    x2 = jax.random.normal(k_x, (B2, 9), dtype=jnp.float32)
    out2 = jax.block_until_ready(rotation_translation_net(x2, params))
    assert out2.shape == (B2, 9)
    assert jnp.allclose(out2, _reference_bf16(x2, params), atol=1e-3, rtol=1e-3), \
        "mismatch vs bf16-matched reference (padded path)"

    # Matched-precision check (tight) and full-f32 check (bf16-level tolerance).
    ref_bf16 = _reference_bf16(x, params)
    ref_f32 = _reference_f32(x, params)
    assert jnp.allclose(out, ref_bf16, atol=1e-3, rtol=1e-3), \
        "mismatch vs bf16-matched reference"
    assert jnp.allclose(out, ref_f32, atol=5e-2, rtol=5e-2), \
        "mismatch vs f32 reference"

    print("KERNEL_OK")
</pallas_src>

<mosaic_0001>
module attributes {stable_mosaic.version = 11 : i64} {
  func.func @_mlp_kernel(%arg0: i32, %arg1: memref<16x9xf32, #tpu.memory_space<vmem>>, %arg2: memref<9x256xbf16, #tpu.memory_space<vmem>>, %arg3: memref<1x256xf32, #tpu.memory_space<vmem>>, %arg4: memref<256x512xbf16, #tpu.memory_space<vmem>>, %arg5: memref<1x512xf32, #tpu.memory_space<vmem>>, %arg6: memref<512x9xbf16, #tpu.memory_space<vmem>>, %arg7: memref<1x9xf32, #tpu.memory_space<vmem>>, %arg8: memref<16x9xf32, #tpu.memory_space<vmem>>) attributes {dimension_semantics = [#tpu.dimension_semantics<parallel>], iteration_bounds = array<i64: 1>, scalar_prefetch = 0 : i64, scratch_operands = 0 : i64, tpu.core_type = #tpu.core_type<tc>, window_params = [{transform_indices = @transform_0, window_bounds = array<i64: 16, 9>}, {pipeline_mode = #tpu.pipeline_mode<synchronous>, transform_indices = @transform_1, window_bounds = array<i64: 9, 256>}, {pipeline_mode = #tpu.pipeline_mode<synchronous>, transform_indices = @transform_2, window_bounds = array<i64: 1, 256>}, {pipeline_mode = #tpu.pipeline_mode<synchronous>, transform_indices = @transform_3, window_bounds = array<i64: 256, 512>}, {pipeline_mode = #tpu.pipeline_mode<synchronous>, transform_indices = @transform_4, window_bounds = array<i64: 1, 512>}, {pipeline_mode = #tpu.pipeline_mode<synchronous>, transform_indices = @transform_5, window_bounds = array<i64: 512, 9>}, {pipeline_mode = #tpu.pipeline_mode<synchronous>, transform_indices = @transform_6, window_bounds = array<i64: 1, 9>}, {transform_indices = @transform_7, window_bounds = array<i64: 16, 9>}]} {
    %c0 = arith.constant 0 : index
    %c0_0 = arith.constant 0 : index
    %0 = vector.load %arg1[%c0, %c0_0] : memref<16x9xf32, #tpu.memory_space<vmem>>, vector<16x9xf32>
    %1 = arith.truncf %0 : vector<16x9xf32> to vector<16x9xbf16>
    %c0_1 = arith.constant 0 : index
    %c0_2 = arith.constant 0 : index
    %2 = vector.load %arg2[%c0_1, %c0_2] : memref<9x256xbf16, #tpu.memory_space<vmem>>, vector<9x256xbf16>
    %cst = arith.constant dense<0.000000e+00> : vector<16x256xf32>
    %3 = tpu.matmul %1, %2, %cst {dimension_numbers = #tpu.dot_dimension_numbers<[1], [0], [0], [1], [0, 0, 1, 1], [], []>} : vector<16x9xbf16>, vector<9x256xbf16>, vector<16x256xf32> -> vector<16x256xf32>
    %c0_3 = arith.constant 0 : index
    %c0_4 = arith.constant 0 : index
    %4 = vector.load %arg3[%c0_3, %c0_4] : memref<1x256xf32, #tpu.memory_space<vmem>>, vector<1x256xf32>
    %5 = vector.broadcast %4 : vector<1x256xf32> to vector<16x256xf32>
    %6 = arith.addf %3, %5 : vector<16x256xf32>
    %cst_5 = arith.constant 0.000000e+00 : f32
    %7 = vector.broadcast %cst_5 : f32 to vector<16x256xf32>
    %8 = arith.maximumf %6, %7 : vector<16x256xf32>
    %9 = arith.truncf %8 : vector<16x256xf32> to vector<16x256xbf16>
    %c0_6 = arith.constant 0 : index
    %c0_7 = arith.constant 0 : index
    %10 = vector.load %arg4[%c0_6, %c0_7] : memref<256x512xbf16, #tpu.memory_space<vmem>>, vector<256x512xbf16>
    %cst_8 = arith.constant dense<0.000000e+00> : vector<16x512xf32>
    %11 = tpu.matmul %9, %10, %cst_8 {dimension_numbers = #tpu.dot_dimension_numbers<[1], [0], [0], [1], [0, 0, 1, 1], [], []>} : vector<16x256xbf16>, vector<256x512xbf16>, vector<16x512xf32> -> vector<16x512xf32>
    %c0_9 = arith.constant 0 : index
    %c0_10 = arith.constant 0 : index
    %12 = vector.load %arg5[%c0_9, %c0_10] : memref<1x512xf32, #tpu.memory_space<vmem>>, vector<1x512xf32>
    %13 = vector.broadcast %12 : vector<1x512xf32> to vector<16x512xf32>
    %14 = arith.addf %11, %13 : vector<16x512xf32>
    %cst_11 = arith.constant 0.000000e+00 : f32
    %15 = vector.broadcast %cst_11 : f32 to vector<16x512xf32>
    %16 = arith.maximumf %14, %15 : vector<16x512xf32>
    %17 = arith.truncf %16 : vector<16x512xf32> to vector<16x512xbf16>
    %c0_12 = arith.constant 0 : index
    %c0_13 = arith.constant 0 : index
    %18 = vector.load %arg6[%c0_12, %c0_13] : memref<512x9xbf16, #tpu.memory_space<vmem>>, vector<512x9xbf16>
    %cst_14 = arith.constant dense<0.000000e+00> : vector<16x9xf32>
    %19 = tpu.matmul %17, %18, %cst_14 {dimension_numbers = #tpu.dot_dimension_numbers<[1], [0], [0], [1], [0, 0, 1, 1], [], []>} : vector<16x512xbf16>, vector<512x9xbf16>, vector<16x9xf32> -> vector<16x9xf32>
    %c0_15 = arith.constant 0 : index
    %c0_16 = arith.constant 0 : index
    %20 = vector.load %arg7[%c0_15, %c0_16] : memref<1x9xf32, #tpu.memory_space<vmem>>, vector<1x9xf32>
    %21 = vector.broadcast %20 : vector<1x9xf32> to vector<16x9xf32>
    %22 = arith.addf %19, %21 : vector<16x9xf32>
    %c0_17 = arith.constant 0 : index
    %c0_18 = arith.constant 0 : index
    %23 = vector.load %arg8[%c0_17, %c0_18] : memref<16x9xf32, #tpu.memory_space<vmem>>, vector<16x9xf32>
    tpu.vector_store %arg8[%c0_17, %c0_18], %22 {strides = array<i32>} : memref<16x9xf32, #tpu.memory_space<vmem>>, vector<16x9xf32>,
    return
  }
  func.func @transform_0(%arg0: i32) -> (i32, i32) {
    %c0_i32 = arith.constant 0 : i32
    %c0_i32_0 = arith.constant 0 : i32
    return %arg0, %c0_i32 : i32, i32
  }
  func.func @transform_1(%arg0: i32) -> (i32, i32) {
    %c0_i32 = arith.constant 0 : i32
    %c0_i32_0 = arith.constant 0 : i32
    %c0_i32_1 = arith.constant 0 : i32
    return %c0_i32, %c0_i32_0 : i32, i32
  }
  func.func @transform_2(%arg0: i32) -> (i32, i32) {
    %c0_i32 = arith.constant 0 : i32
    %c0_i32_0 = arith.constant 0 : i32
    %c0_i32_1 = arith.constant 0 : i32
    return %c0_i32, %c0_i32_0 : i32, i32
  }
  func.func @transform_3(%arg0: i32) -> (i32, i32) {
    %c0_i32 = arith.constant 0 : i32
    %c0_i32_0 = arith.constant 0 : i32
    %c0_i32_1 = arith.constant 0 : i32
    return %c0_i32, %c0_i32_0 : i32, i32
  }
  func.func @transform_4(%arg0: i32) -> (i32, i32) {
    %c0_i32 = arith.constant 0 : i32
    %c0_i32_0 = arith.constant 0 : i32
    %c0_i32_1 = arith.constant 0 : i32
    return %c0_i32, %c0_i32_0 : i32, i32
  }
  func.func @transform_5(%arg0: i32) -> (i32, i32) {
    %c0_i32 = arith.constant 0 : i32
    %c0_i32_0 = arith.constant 0 : i32
    %c0_i32_1 = arith.constant 0 : i32
    return %c0_i32, %c0_i32_0 : i32, i32
  }
  func.func @transform_6(%arg0: i32) -> (i32, i32) {
    %c0_i32 = arith.constant 0 : i32
    %c0_i32_0 = arith.constant 0 : i32
    %c0_i32_1 = arith.constant 0 : i32
    return %c0_i32, %c0_i32_0 : i32, i32
  }
  func.func @transform_7(%arg0: i32) -> (i32, i32) {
    %c0_i32 = arith.constant 0 : i32
    %c0_i32_0 = arith.constant 0 : i32
    return %arg0, %c0_i32 : i32, i32
  }
}

</mosaic_0001>

<bundles_post_ra>
// kernel: rotation_translation_net.1
= control target key start
LH: loop header
LB: loop body
LE: loop exit
PB: predicated region body
PF: predicated region fallthrough
CT: control target
= control target key end

     0   :  { %vm57_vm0 = vcmask 1043456   ;;  %vm58_vm1 = vcmask 1044480   ;;  %v1287_v2 = vmov 65535   ;;  %v1288_v7 = vmov 0   ;;  %s1670_s0 = inlined_call_operand.vmem [shape: f32[16,9], index: 0, kind: input, shape index: {}]   ;;  %s1671_s1 = inlined_call_operand.vmem [shape: bf16[9,256], index: 1, kind: input, shape index: {}]   ;;  %s1672_s2 = inlined_call_operand.vmem [shape: f32[1,256], index: 2, kind: input, shape index: {}]   ;;  %s1673_s3 = inlined_call_operand.vmem [shape: bf16[256,512], index: 3, kind: input, shape index: {}]   ;;  %s1674_s4 = inlined_call_operand.vmem [shape: f32[1,512], index: 4, kind: input, shape index: {}]   ;;  %s1675_s5 = inlined_call_operand.vmem [shape: bf16[512,9], index: 5, kind: input, shape index: {}]   ;;  %s1676_s6 = inlined_call_operand.vmem [shape: f32[1,9], index: 6, kind: input, shape index: {}]   ;;  %s1677_s7 = inlined_call_operand.hbm [shape: f32[16,9], index: 7, kind: output, shape index: {}]  }
   0x1   :  { %v1132_v0 = vld [vmem:[%s1671_s1 + $0x4] ss:$8 sps:$4 sm:$0x1f]   ;;  %v1134_v1 = vld [vmem:[%s1671_s1] ss:$8 sps:$4 sm:$0x1f]   ;;  %99 = vmatprep.mubr.bf16.mxu0 %v1288_v7 }
   0x2   :  { %v59_v3 = vsel %vm57_vm0, 4294967295, %v1287_v2  ;;  %v28_v4 = vld [vmem:[%s1670_s0] sm:$0xff]  ;;  %v29_v5 = vld [vmem:[%s1670_s0 + $0x8] sm:$0xff]  ;;  %vm53_vm2 = vcmask 72704  }
   0x3   :  { %v60_v6 = vsel %vm58_vm1, %v59_v3, 0  ;;  %v1135_v8 = vld [vmem:[%s1673_s3 + $0x4] ss:$16 sps:$4 sm:$0xff]   ;;  %v1139_v11 = vld [vmem:[%s1673_s3 + $0xc] ss:$16 sps:$4 sm:$0xff]   ;;  %v30_v13 = vpack.c.bf16 %v29_v5, %v28_v4 }
   0x4   :  { %v65_v9 = vand.u32 %v1132_v0, %v60_v6  ;;  %v62_v10 = vand.u32 %v1134_v1, %v60_v6  ;;  %522 = vmatprep.subr.bf16.mxu1 %v1135_v8  ;;  %v1140_v12 = vld [vmem:[%s1673_s3] ss:$16 sps:$4 sm:$0xff]   ;;  %v1141_v14 = vld [vmem:[%s1673_s3 + $0x24] ss:$16 sps:$4 sm:$0xff]   ;;  %v1137_v15 = vld [vmem:[%s1673_s3 + $0x8] ss:$16 sps:$4 sm:$0xff]  }
   0x5   :  { %523 = vmatpush1.bf16.msra.mxu1 %v1140_v12  ;;  %v1145_v16 = vld [vmem:[%s1673_s3 + $0x2c] ss:$16 sps:$4 sm:$0xff]   ;;  %v1146_v17 = vld [vmem:[%s1673_s3 + $0x20] ss:$16 sps:$4 sm:$0xff]   ;;  %v1147_v18 = vld [vmem:[%s1673_s3 + $0x44] ss:$16 sps:$4 sm:$0xff]  }
   0x6   :  { %67 = vmatprep.subr.bf16.mxu0 %v65_v9  ;;  %524 = vmatprep.subr.bf16.mxu1 %v1141_v14  ;;  %v1143_v19 = vld [vmem:[%s1673_s3 + $0x28] ss:$16 sps:$4 sm:$0xff]   ;;  %v1152_v20 = vld [vmem:[%s1673_s3 + $0x40] ss:$16 sps:$4 sm:$0xff]   ;;  %v1151_v21 = vld [vmem:[%s1673_s3 + $0x4c] ss:$16 sps:$4 sm:$0xff]  }
   0x7   :  { %68 = vmatpush1.bf16.msra.mxu0 %v62_v10  ;;  %v1153_v22 = vld [vmem:[%s1673_s3 + $0x64] ss:$16 sps:$4 sm:$0xff]   ;;  %v1149_v23 = vld [vmem:[%s1673_s3 + $0x48] ss:$16 sps:$4 sm:$0xff]   ;;  %v1157_v24 = vld [vmem:[%s1673_s3 + $0x6c] ss:$16 sps:$4 sm:$0xff]  }
   0x8   :  { %565 = vmatprep.subr.bf16.mxu0 %v1139_v11  ;;  %v1158_v25 = vld [vmem:[%s1673_s3 + $0x60] ss:$16 sps:$4 sm:$0xff]   ;;  %v1159_v26 = vld [vmem:[%s1673_s3 + $0x84] ss:$16 sps:$4 sm:$0xff]   ;;  %v1155_v27 = vld [vmem:[%s1673_s3 + $0x68] ss:$16 sps:$4 sm:$0xff]  }
   0x9   :  { %525 = vmatpush1.bf16.msra.mxu1 %v1146_v17  ;;  %v1164_v28 = vld [vmem:[%s1673_s3 + $0x80] ss:$16 sps:$4 sm:$0xff]   ;;  %v1163_v29 = vld [vmem:[%s1673_s3 + $0x8c] ss:$16 sps:$4 sm:$0xff]   ;;  %v1165_v30 = vld [vmem:[%s1673_s3 + $0xa4] ss:$16 sps:$4 sm:$0xff]  }
   0xa   :  { %985 = vmatmul.mubr.msk.bf16.vlgmr.msra.gmra.mrb[0].mxu0 %vm53_vm2, %v30_v13  ;;  %526 = vmatprep.subr.bf16.mxu1 %v1147_v18  ;;  %v1161_v31 = vld [vmem:[%s1673_s3 + $0x88] ss:$16 sps:$4 sm:$0xff]   ;;  %v1169_v32 = vld [vmem:[%s1673_s3 + $0xac] ss:$16 sps:$4 sm:$0xff]   ;;  %v1170_v33 = vld [vmem:[%s1673_s3 + $0xa0] ss:$16 sps:$4 sm:$0xff]  }
   0xb   :  { %566 = vmatpush1.bf16.msra.mxu0 %v1137_v15  ;;  %v1171_v34 = vld [vmem:[%s1673_s3 + $0xc4] ss:$16 sps:$4 sm:$0xff]   ;;  %v1167_v35 = vld [vmem:[%s1673_s3 + $0xa8] ss:$16 sps:$4 sm:$0xff]   ;;  %v1176_v36 = vld [vmem:[%s1673_s3 + $0xc0] ss:$16 sps:$4 sm:$0xff]  }
   0xc   :  { %567 = vmatprep.subr.bf16.mxu0 %v1145_v16  ;;  %v1175_v37 = vld [vmem:[%s1673_s3 + $0xcc] ss:$16 sps:$4 sm:$0xff]   ;;  %v1177_v38 = vld [vmem:[%s1673_s3 + $0xe4] ss:$16 sps:$4 sm:$0xff]   ;;  %v1173_v39 = vld [vmem:[%s1673_s3 + $0xc8] ss:$16 sps:$4 sm:$0xff]  }
   0xd   :  { %527 = vmatpush1.bf16.msra.mxu1 %v1152_v20  ;;  %v1181_v40 = vld [vmem:[%s1673_s3 + $0xec] ss:$16 sps:$4 sm:$0xff]   ;;  %v1182_v41 = vld [vmem:[%s1673_s3 + $0xe0] ss:$16 sps:$4 sm:$0xff]   ;;  %v1183_v42 = vld [vmem:[%s1673_s3 + $0x104] ss:$16 sps:$4 sm:$0xff]  }
   0xe   :  { %528 = vmatprep.subr.bf16.mxu1 %v1153_v22  ;;  %v1179_v43 = vld [vmem:[%s1673_s3 + $0xe8] ss:$16 sps:$4 sm:$0xff]   ;;  %v1188_v44 = vld [vmem:[%s1673_s3 + $0x100] ss:$16 sps:$4 sm:$0xff]   ;;  %v1187_v45 = vld [vmem:[%s1673_s3 + $0x10c] ss:$16 sps:$4 sm:$0xff]  }
   0xf   :  { %568 = vmatpush1.bf16.msra.mxu0 %v1143_v19  ;;  %v1189_v46 = vld [vmem:[%s1673_s3 + $0x124] ss:$16 sps:$4 sm:$0xff]   ;;  %v1185_v47 = vld [vmem:[%s1673_s3 + $0x108] ss:$16 sps:$4 sm:$0xff]   ;;  %v1193_v48 = vld [vmem:[%s1673_s3 + $0x12c] ss:$16 sps:$4 sm:$0xff]  }
  0x10   :  { %569 = vmatprep.subr.bf16.mxu0 %v1151_v21  ;;  %v1194_v49 = vld [vmem:[%s1673_s3 + $0x120] ss:$16 sps:$4 sm:$0xff]   ;;  %v1195_v50 = vld [vmem:[%s1673_s3 + $0x144] ss:$16 sps:$4 sm:$0xff]   ;;  %v1191_v51 = vld [vmem:[%s1673_s3 + $0x128] ss:$16 sps:$4 sm:$0xff]  }
  0x11   :  { %529 = vmatpush1.bf16.msra.mxu1 %v1158_v25  ;;  %v1200_v52 = vld [vmem:[%s1673_s3 + $0x140] ss:$16 sps:$4 sm:$0xff]   ;;  %v1199_v53 = vld [vmem:[%s1673_s3 + $0x14c] ss:$16 sps:$4 sm:$0xff]   ;;  %v1201_v54 = vld [vmem:[%s1673_s3 + $0x164] ss:$16 sps:$4 sm:$0xff]  }
  0x12   :  { %530 = vmatprep.subr.bf16.mxu1 %v1159_v26  ;;  %v1197_v55 = vld [vmem:[%s1673_s3 + $0x148] ss:$16 sps:$4 sm:$0xff]   ;;  %v1206_v56 = vld [vmem:[%s1673_s3 + $0x160] ss:$16 sps:$4 sm:$0xff]   ;;  %v1205_v57 = vld [vmem:[%s1673_s3 + $0x16c] ss:$16 sps:$4 sm:$0xff]  }
  0x13   :  { %570 = vmatpush1.bf16.msra.mxu0 %v1149_v23  ;;  %v1207_v58 = vld [vmem:[%s1673_s3 + $0x184] ss:$16 sps:$4 sm:$0xff]   ;;  %v1203_v59 = vld [vmem:[%s1673_s3 + $0x168] ss:$16 sps:$4 sm:$0xff]   ;;  %v1212_v60 = vld [vmem:[%s1673_s3 + $0x180] ss:$16 sps:$4 sm:$0xff]  }
  0x14   :  { %571 = vmatprep.subr.bf16.mxu0 %v1157_v24  ;;  %v1211_v61 = vld [vmem:[%s1673_s3 + $0x18c] ss:$16 sps:$4 sm:$0xff]   ;;  %v1213_v62 = vld [vmem:[%s1673_s3 + $0x1a4] ss:$16 sps:$4 sm:$0xff]   ;;  %v1209_v63 = vld [vmem:[%s1673_s3 + $0x188] ss:$16 sps:$4 sm:$0xff]  }
  0x15   :  { %531 = vmatpush1.bf16.msra.mxu1 %v1164_v28  ;;  %v1217_v0 = vld [vmem:[%s1673_s3 + $0x1ac] ss:$16 sps:$4 sm:$0xff]   ;;  %v1215_v1 = vld [vmem:[%s1673_s3 + $0x1a8] ss:$16 sps:$4 sm:$0xff]  }
  0x16   :  { %532 = vmatprep.subr.bf16.mxu1 %v1165_v30 }
  0x17   :  { %572 = vmatpush1.bf16.msra.mxu0 %v1155_v27 }
  0x18   :  { %573 = vmatprep.subr.bf16.mxu0 %v1163_v29 }
  0x19   :  { %533 = vmatpush1.bf16.msra.mxu1 %v1170_v33 }
  0x1a   :  { %534 = vmatprep.subr.bf16.mxu1 %v1171_v34 }
  0x1b   :  { %574 = vmatpush1.bf16.msra.mxu0 %v1161_v31 }
  0x1c   :  { %575 = vmatprep.subr.bf16.mxu0 %v1169_v32 }
  0x1d   :  { %535 = vmatpush1.bf16.msra.mxu1 %v1176_v36 }
  0x1e   :  { %536 = vmatprep.subr.bf16.mxu1 %v1177_v38 }
  0x1f   :  { %576 = vmatpush1.bf16.msra.mxu0 %v1167_v35 }
  0x20   :  { %577 = vmatprep.subr.bf16.mxu0 %v1175_v37 }
  0x21   :  { %537 = vmatpush1.bf16.msra.mxu1 %v1182_v41 }
  0x22   :  { %538 = vmatprep.subr.bf16.mxu1 %v1183_v42 }
  0x23   :  { %578 = vmatpush1.bf16.msra.mxu0 %v1173_v39 }
  0x24   :  { %579 = vmatprep.subr.bf16.mxu0 %v1181_v40 }
  0x25   :  { %539 = vmatpush1.bf16.msra.mxu1 %v1188_v44 }
  0x26   :  { %540 = vmatprep.subr.bf16.mxu1 %v1189_v46 }
  0x27   :  { %580 = vmatpush1.bf16.msra.mxu0 %v1179_v43 }
  0x28   :  { %581 = vmatprep.subr.bf16.mxu0 %v1187_v45 }
  0x29   :  { %541 = vmatpush1.bf16.msra.mxu1 %v1194_v49 }
  0x2a   :  { %542 = vmatprep.subr.bf16.mxu1 %v1195_v50 }
  0x2b   :  { %582 = vmatpush1.bf16.msra.mxu0 %v1185_v47 }
  0x2c   :  { %583 = vmatprep.subr.bf16.mxu0 %v1193_v48 }
  0x2d   :  { %543 = vmatpush1.bf16.msra.mxu1 %v1200_v52 }
  0x2e   :  { %544 = vmatprep.subr.bf16.mxu1 %v1201_v54 }
  0x2f   :  { %584 = vmatpush1.bf16.msra.mxu0 %v1191_v51 }
  0x30   :  { %585 = vmatprep.subr.bf16.mxu0 %v1199_v53 }
  0x31   :  { %545 = vmatpush1.bf16.msra.mxu1 %v1206_v56 }
  0x32   :  { %546 = vmatprep.subr.bf16.mxu1 %v1207_v58 }
  0x33   :  { %586 = vmatpush1.bf16.msra.mxu0 %v1197_v55 }
  0x34   :  { %587 = vmatprep.subr.bf16.mxu0 %v1205_v57 }
  0x35   :  { %547 = vmatpush1.bf16.msra.mxu1 %v1212_v60 }
  0x36   :  { %548 = vmatprep.subr.bf16.mxu1 %v1213_v62 }
  0x37   :  { %588 = vmatpush1.bf16.msra.mxu0 %v1203_v59 }
  0x38   :  { %589 = vmatprep.subr.bf16.mxu0 %v1211_v61 }
  0x3b   :  { %590 = vmatpush1.bf16.msra.mxu0 %v1209_v63 }
  0x3c   :  { %591 = vmatprep.subr.bf16.mxu0 %v1217_v0 }
  0x3f   :  { %592 = vmatpush1.bf16.msra.mxu0 %v1215_v1 }
  0x40   :  { %12 = vsyncpa [#allocation3], 0  ;;  %v1218_v2 = vld [vmem:[%s1673_s3 + $0x1a0] ss:$16 sps:$4 sm:$0xff]   ;;  %v1219_v3 = vld [vmem:[%s1673_s3 + $0x1c4] ss:$16 sps:$4 sm:$0xff]   ;;  %v35_v13 = vlaneseq }
  0x41   :  { %549 = vmatpush1.bf16.msra.mxu1 %v1218_v2  ;;  %v1223_v4 = vld [vmem:[%s1673_s3 + $0x1cc] ss:$16 sps:$4 sm:$0xff]   ;;  %v1221_v5 = vld [vmem:[%s1673_s3 + $0x1c8] ss:$16 sps:$4 sm:$0xff]   ;;  %v1224_v6 = vld [vmem:[%s1673_s3 + $0x1c0] ss:$16 sps:$4 sm:$0xff]  }
  0x42   :  { %550 = vmatprep.subr.bf16.mxu1 %v1219_v3  ;;  %593 = vmatprep.subr.bf16.mxu0 %v1223_v4  ;;  %v1225_v7 = vld [vmem:[%s1673_s3 + $0x1e4] ss:$16 sps:$4 sm:$0xff]   ;;  %v1229_v8 = vld [vmem:[%s1673_s3 + $0x1ec] ss:$16 sps:$4 sm:$0xff]   ;;  %v1227_v9 = vld [vmem:[%s1673_s3 + $0x1e8] ss:$16 sps:$4 sm:$0xff]  }
  0x43   :  { %594 = vmatpush1.bf16.msra.mxu0 %v1221_v5  ;;  %v1230_v10 = vld [vmem:[%s1673_s3 + $0x1e0] ss:$16 sps:$4 sm:$0xff]   ;;  %v1543_v14 = vshrl.u32 %v35_v13, 7  ;;  %v1235_v36 = vld [vmem:[%s1675_s5 + $0x48] sm:$0xff]   ;;  %v1243_v44 = vld [vmem:[%s1675_s5 + $0x58] sm:$0xff]   ;;  %s1289_s22 = smov [#allocation2]  }
  0x44   :  { %595 = vmatprep.subr.bf16.mxu0 %v1229_v8  ;;  %v1231_v11 = vld [vmem:[%s1675_s5 + $0x40] sm:$0xff]   ;;  %v1236_v37 = vld [vmem:[%s1675_s5 + $0xc8] sm:$0xff]   ;;  %v1239_v40 = vld [vmem:[%s1675_s5 + $0x50] sm:$0xff]   ;;  %s972_s23 = sshll.u32 %s1289_s22, 4  ;;  %s973_s23 = int_to_ptr.vmem [resolvable:$true] %s972_s23 }
  0x45   :  { %551 = vmatpush1.bf16.msra.mxu1 %v1224_v6  ;;  %v1232_v12 = vld [vmem:[%s1675_s5 + $0xc0] sm:$0xff]   ;;  %v37_v15 = vsub.s32 0, %v1543_v14  ;;  %v41_v17 = vsub.s32 1, %v1543_v14  ;;  %v1237_v38 = vld [vmem:[%s1675_s5 + $0x8] sm:$0xff]   ;;  %v1240_v41 = vld [vmem:[%s1675_s5 + $0xd0] sm:$0xff]   ;;  %v192_v0 = vsub.s32 2, %v1543_v14  ;;  %p1268_p1 = scmp.lt.s32.totalorder %s973_s23, %s973_s23 }
  0x46   :  { %552 = vmatprep.subr.bf16.mxu1 %v1225_v7  ;;  %v33_v16 = vld [vmem:[%s1672_s2] sm:$0x3]  ;;  %v1238_v39 = vld [vmem:[%s1675_s5 + $0x88] sm:$0xff]   ;;  %v1241_v42 = vld [vmem:[%s1675_s5 + $0x10] sm:$0xff]   ;;  %v196_v2 = vsub.s32 3, %v1543_v14 }
  0x47   :  { %596 = vmatpush1.bf16.msra.mxu0 %v1227_v9  ;;  %v38_v18 = vrot.slane %v33_v16, %v37_v15  ;;  %v42_v19 = vrot.slane %v33_v16, %v41_v17  ;;  %v1233_v34 = vld [vmem:[%s1675_s5] sm:$0xff]   ;;  %v1242_v43 = vld [vmem:[%s1675_s5 + $0x90] sm:$0xff]   ;;  %v1244_v45 = vld [vmem:[%s1675_s5 + $0xd8] sm:$0xff]  }
  0x48   :  { %1105 = vmatprep.subr.bf16.mxu0 %v1232_v12  ;;  %v1234_v35 = vld [vmem:[%s1675_s5 + $0x80] sm:$0xff]   ;;  %v1245_v46 = vld [vmem:[%s1675_s5 + $0x18] sm:$0xff]   ;;  %v1251_v52 = vld [vmem:[%s1675_s5 + $0x68] sm:$0xff]  }
  0x49   :  { %553 = vmatpush1.bf16.msra.mxu1 %v1230_v10  ;;  %v1246_v47 = vld [vmem:[%s1675_s5 + $0x98] sm:$0xff]   ;;  %v1247_v48 = vld [vmem:[%s1675_s5 + $0x60] sm:$0xff]   ;;  %v1252_v53 = vld [vmem:[%s1675_s5 + $0xe8] sm:$0xff]  }
  0x4a   :  { %1083 = vmatprep.subr.bf16.mxu1 %v1231_v11  ;;  %v1248_v49 = vld [vmem:[%s1675_s5 + $0xe0] sm:$0xff]   ;;  %v1253_v54 = vld [vmem:[%s1675_s5 + $0x28] sm:$0xff]   ;;  %v1255_v56 = vld [vmem:[%s1675_s5 + $0x70] sm:$0xff]  }
  0x4b   :  { %v1249_v50 = vld [vmem:[%s1675_s5 + $0x20] sm:$0xff]   ;;  %v1254_v55 = vld [vmem:[%s1675_s5 + $0xa8] sm:$0xff]   ;;  %v1256_v57 = vld [vmem:[%s1675_s5 + $0xf0] sm:$0xff]  }
  0x4c   :  { %v1250_v51 = vld [vmem:[%s1675_s5 + $0xa0] sm:$0xff]   ;;  %v1257_v58 = vld [vmem:[%s1675_s5 + $0x30] sm:$0xff]   ;;  %v1259_v60 = vld [vmem:[%s1675_s5 + $0x78] sm:$0xff]  }
  0x4d   :  { %v1258_v59 = vld [vmem:[%s1675_s5 + $0xb0] sm:$0xff]   ;;  %v1260_v61 = vld [vmem:[%s1675_s5 + $0xf8] sm:$0xff]   ;;  %v180_v1 = vld [vmem:[%s1674_s4] sm:$0xf] }
  0x4e   :  { %v1261_v62 = vld [vmem:[%s1675_s5 + $0x38] sm:$0xff]   ;;  %v185_v3 = vrot.slane %v180_v1, %v37_v15  ;;  %v193_v4 = vrot.slane %v180_v1, %v192_v0  ;;  %v189_v5 = vrot.slane %v180_v1, %v41_v17  ;;  %v197_v6 = vrot.slane %v180_v1, %v196_v2 }
  0x4f   :  { %v1262_v63 = vld [vmem:[%s1675_s5 + $0xb8] sm:$0xff]  }
  0xdd   :  { %v101_v20 = vpop.f32.mrb[0].mxu0 }
  0xde   :  { %v102_v21 = vadd.f32 %v101_v20, %v38_v18  ;;  %v103_v22 = vpop.f32.mrb[1].mxu0 }
  0xdf   :  { %v104_v23 = vadd.f32 %v103_v22, %v42_v19  ;;  %v105_v24 = vpop.f32.mrb[2].mxu0 }
  0xe0   :  { %v106_v25 = vadd.f32 %v105_v24, %v38_v18  ;;  %v107_v26 = vpop.f32.mrb[3].mxu0  ;;  %v110_v28 = vmax.f32 %v102_v21, 0.0 }
  0xe1   :  { %v108_v27 = vadd.f32 %v107_v26, %v42_v19  ;;  %v111_v30 = vmax.f32 %v104_v23, 0.0 }
  0xe2   :  { %v112_v29 = vmax.f32 %v106_v25, 0.0 }
  0xe3   :  { %v113_v31 = vmax.f32 %v108_v27, 0.0 }
  0xe4   :  { %v114_v32 = vpack.c.bf16 %v112_v29, %v110_v28 }
  0xe5   :  { %v115_v33 = vpack.c.bf16 %v113_v31, %v111_v30 }
  0xe7   :  { %554 = vmatprep.mubr.bf16.mxu1 %v115_v33  ;;  %597 = vmatprep.mubr.bf16.mxu0 %v115_v33 }
  0xe8   :  { %555 = vmatmul.mubr.bf16.vlgmr.msra.gmra.mrb[0].mxu1 %v114_v32  ;;  %598 = vmatmul.mubr.bf16.vlgmr.msra.gmra.mrb[4].mxu0 %v114_v32 }
  0xe9   :  { %1084 = vmatpush3.bf16.msra.mxu1 %v1233_v34  ;;  %1106 = vmatpush3.bf16.msra.mxu0 %v1234_v35 }
  0xea   :  { %1085 = vmatprep.subr.bf16.mxu1 %v1235_v36  ;;  %1107 = vmatprep.subr.bf16.mxu0 %v1236_v37  ;;  %v1050_v37 = vld [vmem:[%s1676_s6] ss:$0 sm:$0xff]  ;;  %s1263_s6 = scalar_lea.vmem %s973_s23, 256 }
  0xeb   :  { %p1264_p0 = scmp.ne.s32.totalorder %s973_s23, %s1263_s6  ;;  %p1269_p2 = scmp.lt.s32.totalorder %s1263_s6, %s1263_s6 }
  0xed   :  { %1086 = vmatpush3.bf16.msra.mxu1 %v1237_v38  ;;  %1108 = vmatpush3.bf16.msra.mxu0 %v1238_v39  ;;  %p1270_p3 = por %p1269_p2, %p1268_p1 }
  0xee   :  { %1087 = vmatprep.subr.bf16.mxu1 %v1239_v40  ;;  %1109 = vmatprep.subr.bf16.mxu0 %v1240_v41 }
  0xef   :  { %p1271_p4 = pnand %p1270_p3, %p1264_p0 }
  0xf1   :  { %1088 = vmatpush3.bf16.msra.mxu1 %v1241_v42  ;;  %1110 = vmatpush3.bf16.msra.mxu0 %v1242_v43 }
  0xf2   :  { %1089 = vmatprep.subr.bf16.mxu1 %v1243_v44  ;;  %1111 = vmatprep.subr.bf16.mxu0 %v1244_v45 }
  0xf5   :  { %1090 = vmatpush3.bf16.msra.mxu1 %v1245_v46  ;;  %1112 = vmatpush3.bf16.msra.mxu0 %v1246_v47 }
  0xf6   :  { %1091 = vmatprep.subr.bf16.mxu1 %v1247_v48  ;;  %1113 = vmatprep.subr.bf16.mxu0 %v1248_v49 }
  0xf9   :  { %1092 = vmatpush3.bf16.msra.mxu1 %v1249_v50  ;;  %1114 = vmatpush3.bf16.msra.mxu0 %v1250_v51 }
  0xfa   :  { %1093 = vmatprep.subr.bf16.mxu1 %v1251_v52  ;;  %1115 = vmatprep.subr.bf16.mxu0 %v1252_v53 }
  0xfd   :  { %1094 = vmatpush3.bf16.msra.mxu1 %v1253_v54  ;;  %1116 = vmatpush3.bf16.msra.mxu0 %v1254_v55 }
  0xfe   :  { %1095 = vmatprep.subr.bf16.mxu1 %v1255_v56  ;;  %1117 = vmatprep.subr.bf16.mxu0 %v1256_v57 }
 0x101   :  { %1096 = vmatpush3.bf16.msra.mxu1 %v1257_v58  ;;  %1118 = vmatpush3.bf16.msra.mxu0 %v1258_v59 }
 0x102   :  { %1097 = vmatprep.subr.bf16.mxu1 %v1259_v60  ;;  %1119 = vmatprep.subr.bf16.mxu0 %v1260_v61 }
 0x105   :  { %1098 = vmatpush3.bf16.msra.mxu1 %v1261_v62  ;;  %1120 = vmatpush3.bf16.msra.mxu0 %v1262_v63 }
 0x1bb   :  { %v556_v7 = vpop.f32.mrb[0].mxu1  ;;  %v599_v8 = vpop.f32.mrb[4].mxu0 }
 0x1bc   :  { %v557_v9 = vadd.f32 %v556_v7, %v185_v3  ;;  %v600_v10 = vadd.f32 %v599_v8, %v193_v4  ;;  %v558_v11 = vpop.f32.mrb[1].mxu1  ;;  %v601_v12 = vpop.f32.mrb[5].mxu0 }
 0x1bd   :  { %v559_v13 = vadd.f32 %v558_v11, %v189_v5  ;;  %v602_v16 = vadd.f32 %v601_v12, %v197_v6  ;;  %v560_v18 = vpop.f32.mrb[2].mxu1  ;;  %v603_v19 = vpop.f32.mrb[6].mxu0 }
 0x1be   :  { %v561_v20 = vadd.f32 %v560_v18, %v185_v3  ;;  %v604_v21 = vadd.f32 %v603_v19, %v193_v4  ;;  %v562_v22 = vpop.f32.mrb[3].mxu1  ;;  %v605_v23 = vpop.f32.mrb[7].mxu0  ;;  %v608_v25 = vmax.f32 %v557_v9, 0.0  ;;  %v610_v14 = vmax.f32 %v600_v10, 0.0 }
 0x1bf   :  { %v563_v15 = vadd.f32 %v562_v22, %v189_v5  ;;  %v606_v24 = vadd.f32 %v605_v23, %v197_v6  ;;  %v609_v27 = vmax.f32 %v559_v13, 0.0  ;;  %v611_v28 = vmax.f32 %v602_v16, 0.0 }
 0x1c0   :  { %v612_v17 = vmax.f32 %v561_v20, 0.0  ;;  %v614_v26 = vmax.f32 %v604_v21, 0.0 }
 0x1c1   :  { %v613_v29 = vmax.f32 %v563_v15, 0.0  ;;  %v615_v30 = vmax.f32 %v606_v24, 0.0 }
 0x1c2   :  { %v616_v31 = vpack.c.bf16 %v612_v17, %v608_v25  ;;  %v618_v32 = vpack.c.bf16 %v614_v26, %v610_v14 }
 0x1c3   :  { %v617_v33 = vpack.c.bf16 %v613_v29, %v609_v27  ;;  %v619_v34 = vpack.c.bf16 %v615_v30, %v611_v28 }
 0x1c5   :  { %915 = vmatprep.mubr.bf16.mxu1 %v617_v33  ;;  %956 = vmatprep.mubr.bf16.mxu0 %v619_v34 }
 0x1c6   :  { %916 = vmatmul.mubr.bf16.vlgmr.msra.gmra.mrb[4].mxu1 %v616_v31  ;;  %957 = vmatmul.mubr.bf16.vlgmr.msra.gmra.mrb[8].mxu0 %v618_v32 }
 0x299   :  { %v1099_v35 = vpop.f32.mrb[4].mxu1  ;;  %v1121_v36 = vpop.f32.mrb[8].mxu0 }
 0x29a   :  { %v1100_v38 = vpop.f32.mrb[5].mxu1  ;;  %v1122_v39 = vpop.f32.mrb[9].mxu0 }
 0x29b   :  { %v1101_v40 = vadd.f32 %v1100_v38, %v1099_v35  ;;  %v1123_v41 = vadd.f32 %v1122_v39, %v1121_v36  ;;  %v1102_v42 = vpop.f32.mrb[6].mxu1  ;;  %v1124_v43 = vpop.f32.mrb[10].mxu0 }
 0x29c   :  { %v1103_v44 = vpop.f32.mrb[7].mxu1  ;;  %v1125_v45 = vpop.f32.mrb[11].mxu0 }
 0x29d   :  { %v918_v46 = vadd.f32 %v1101_v40, %v1050_v37  ;;  %v1104_v47 = vadd.f32 %v1103_v44, %v1102_v42  ;;  %v1126_v48 = vadd.f32 %v1125_v45, %v1124_v43 }
 0x29f   :  { %v959_v49 = vadd.f32 %v1123_v41, %v918_v46  ;;  %v921_v50 = vadd.f32 %v1104_v47, %v1050_v37 }
 0x2a1   :  { %965 = vst.msk [vmem:[#allocation2] sm:$0xff] %vm53_vm2, %v959_v49  ;;  %v962_v51 = vadd.f32 %v1126_v48, %v921_v50 }
 0x2a3   :  { %966 = vst.msk [vmem:[#allocation2 + $0x8] sm:$0xff] %vm53_vm2, %v962_v51 }
 0x2a4   :  { %1274 = shalt.err (!%p1271_p4)
}
 0x2a5   :  { %s1275_s26 = scalar_lea.hbm %s1677_s7, 256 }
 0x2a6   :  { %p1276_p5 = scmp.ne.s32.totalorder %s1677_s7, %s1275_s26  ;;  %p1279_p6 = scmp.lt.u32.totalorder %s1275_s26, %s1677_s7 }
 0x2a8   :  { %p1281_p7 = pnand %p1279_p6, %p1276_p5 }
 0x2aa   :  { %1284 = shalt.err (!%p1281_p7)
}
 0x2ab   :  { %s1290_s8 = smov 128   ;;  %s1291_s9 = smov 8  }
 0x2ac   :  { %978 = dma.vmem_to_hbm [thread:$0]  %s973_s23, 256, %s1677_s7, [#allocation3], %s1290_s8, %s1290_s8, %s1291_s9  }
 0x2ad   :  { %1285 = dma.done.wait [#allocation3], 256  }
 0x2ae   :  { %1286 = vsyncadd [#allocation3], 4294967040 }
 0x2af   :  { %982 = vsyncpa [#allocation3], 1 }

</bundles_post_ra>
